<compile_context>
chip_gen: v7x
topology: tpu7x:2x2x1
jax: 0.10.0
libtpu: 0.0.40
codegen_flags: <defaults>
</compile_context>

<pallas_src>
import jax
import jax.numpy as jnp
from jax.experimental import pallas as pl
from jax.experimental.pallas import tpu as pltpu


_BATCH_TILE = 256  # rows per grid step once the batch exceeds one tile


def _gather_kernel(t_ref, tab_ref, out_ref):
    # t_ref:   (tb, 1)     int32    (VMEM)  -- timestep indices (tile of batch)
    # tab_ref: (2, T_pad)  float32  (VMEM)  -- row 0 = beta, row 1 = alpha
    # out_ref: (tb, 128)   float32  (VMEM)  -- lane 0 = beta[t], lane 1 = alpha[t]
    t = t_ref[...]                                    # (tb, 1)
    tb = t.shape[0]
    t_pad = tab_ref.shape[1]
    out_w = out_ref.shape[1]

    lane_t = jax.lax.broadcasted_iota(jnp.int32, (tb, t_pad), 1)
    hit = lane_t == t                                 # (tb, T_pad), VPU compare

    beta_row = tab_ref[0:1, :]                        # (1, T_pad)
    alpha_row = tab_ref[1:2, :]                       # (1, T_pad)

    # where-select (no cast, no mul) + XLU lane reduction.
    beta_col = jnp.sum(jnp.where(hit, beta_row, 0.0), axis=1, keepdims=True)    # (tb, 1)
    alpha_col = jnp.sum(jnp.where(hit, alpha_row, 0.0), axis=1, keepdims=True)  # (tb, 1)

    # Pack both results into one lane-dense slab with a single nested select:
    # lane 0 = beta, lane 1 = alpha, other lanes 0.
    out_lane = jax.lax.broadcasted_iota(jnp.int32, (tb, out_w), 1)
    out_ref[...] = jnp.where(out_lane == 0, beta_col,
                             jnp.where(out_lane == 1, alpha_col, 0.0))


def _pad_to(x, n, axis):
    pad = n - x.shape[axis]
    if pad == 0:
        return x
    widths = [(0, 0)] * x.ndim
    widths[axis] = (0, pad)
    return jnp.pad(x, widths)


@jax.jit  # cached per (b_pad, t_pad) bucket -> no per-call retrace/recompile
def _gather_call(t2d, table):
    b_pad = t2d.shape[0]        # static under jit
    t_pad = table.shape[1]
    out_shape = jax.ShapeDtypeStruct((b_pad, 128), jnp.float32)

    if b_pad <= _BATCH_TILE:
        # Gridless single-block call: zero per-step overhead. Best on all
        # generations for small/typical training batches.
        return pl.pallas_call(
            _gather_kernel,
            out_shape=out_shape,
            in_specs=[
                pl.BlockSpec((b_pad, 1), lambda: (0, 0)),
                pl.BlockSpec((2, t_pad), lambda: (0, 0)),
            ],
            out_specs=pl.BlockSpec((b_pad, 128), lambda: (0, 0)),
        )(t2d, table)

    # Large batch: grid over batch tiles so the O(B*T) one-hot work does not
    # saturate a single core's VALU slots. The table block stays fully
    # resident (same block index every step). "parallel" lets v7x's two
    # TensorCores split the axis; on v5e/v6e it is simply a serial loop.
    n_tiles = b_pad // _BATCH_TILE
    return pl.pallas_call(
        _gather_kernel,
        out_shape=out_shape,
        grid=(n_tiles,),
        in_specs=[
            pl.BlockSpec((_BATCH_TILE, 1), lambda i: (i, 0)),
            pl.BlockSpec((2, t_pad), lambda i: (0, 0)),
        ],
        out_specs=pl.BlockSpec((_BATCH_TILE, 128), lambda i: (i, 0)),
        compiler_params=pltpu.CompilerParams(
            dimension_semantics=("parallel",)),
    )(t2d, table)


class DDPMSchedulerPallas:
    def __init__(self, num_time_steps: int = 1000):
        self.num_time_steps = num_time_steps
        # Parameter setup (glue, mirrors the torch __init__ exactly).
        self.beta = jnp.linspace(0.0001, 0.02, num_time_steps, dtype=jnp.float32)
        self.alpha = jnp.cumprod(1.0 - self.beta, axis=0).astype(jnp.float32)
        self._t_pad = ((num_time_steps + 127) // 128) * 128
        # Single merged (2, T_pad) table, kept as a persistent device constant.
        self.table = jnp.stack(
            [_pad_to(self.beta, self._t_pad, 0),
             _pad_to(self.alpha, self._t_pad, 0)],
            axis=0,
        )

    def _normalize_t(self, t):
        t = jnp.asarray(t, dtype=jnp.int32)
        # Torch advanced-indexing semantics for negative indices in [-T, -1].
        return jnp.where(t < 0, t + self.num_time_steps, t)

    def __call__(self, t):
        t = self._normalize_t(t)
        assert t.ndim == 1, "this wrapper supports 1-D index tensors t"
        b = t.shape[0]
        # Bucket the batch to a power of two >= 8 so the pallas_call shape
        # (and hence the compiled kernel) stays stable across calls.
        b_pad = max(8, int(pl.next_power_of_2(b)))
        t2d = _pad_to(t, b_pad, 0).reshape(b_pad, 1)

        out = _gather_call(t2d, self.table)        # (b_pad, 128)
        return out[:b, 0], out[:b, 1]              # (beta[t], alpha[t])

    def forward_xla(self, t):
        # Pure-JAX path for callers that embed the scheduler inside a larger
        # jitted graph: lets XLA fuse the gather into the consumer and skips
        # the standalone Pallas launch entirely (review item #1).
        t = self._normalize_t(t)
        return jnp.take(self.beta, t), jnp.take(self.alpha, t)


if __name__ == "__main__":
    key = jax.random.PRNGKey(0)
    num_time_steps = 1000
    batch = 8
    t = jax.random.randint(key, (batch,), 0, num_time_steps, dtype=jnp.int32)

    sched = DDPMSchedulerPallas(num_time_steps=num_time_steps)
    beta_t, alpha_t = sched(t)
    jax.block_until_ready((beta_t, alpha_t))

    # Reference check against plain-JAX gather (mirrors the torch forward).
    beta_ref = jnp.linspace(0.0001, 0.02, num_time_steps, dtype=jnp.float32)
    alpha_ref = jnp.cumprod(1.0 - beta_ref, axis=0)
    assert jnp.allclose(beta_t, beta_ref[t], atol=1e-6)
    assert jnp.allclose(alpha_t, alpha_ref[t], atol=1e-6)
    assert beta_t.shape == (batch,) and alpha_t.shape == (batch,)
    assert beta_t.dtype == jnp.float32 and alpha_t.dtype == jnp.float32

    # Different batch size hits the same jit bucket rules and must stay correct.
    t_small = t[:3]
    beta_s, alpha_s = sched(t_small)
    jax.block_until_ready((beta_s, alpha_s))
    assert jnp.allclose(beta_s, beta_ref[t_small], atol=1e-6)
    assert jnp.allclose(alpha_s, alpha_ref[t_small], atol=1e-6)

    # Negative indices follow torch advanced-indexing semantics (t=-1 -> last).
    t_neg = jnp.array([-1, -num_time_steps, 0], dtype=jnp.int32)
    beta_n, alpha_n = sched(t_neg)
    jax.block_until_ready((beta_n, alpha_n))
    assert jnp.allclose(beta_n, beta_ref[jnp.array([num_time_steps - 1, 0, 0])], atol=1e-6)
    assert jnp.allclose(alpha_n, alpha_ref[jnp.array([num_time_steps - 1, 0, 0])], atol=1e-6)

    # Large batch exercises the gridded (parallel-on-v7x) path.
    key2 = jax.random.PRNGKey(0)
    t_big = jax.random.randint(key2, (300,), 0, num_time_steps, dtype=jnp.int32)
    beta_b, alpha_b = sched(t_big)
    jax.block_until_ready((beta_b, alpha_b))
    assert jnp.allclose(beta_b, beta_ref[t_big], atol=1e-6)
    assert jnp.allclose(alpha_b, alpha_ref[t_big], atol=1e-6)

    # XLA-fused fallback stays consistent with the kernel path.
    beta_x, alpha_x = sched.forward_xla(t)
    assert jnp.allclose(beta_x, beta_t, atol=0.0)
    assert jnp.allclose(alpha_x, alpha_t, atol=0.0)

    print("KERNEL_OK")
</pallas_src>

<mosaic_0001>
module attributes {stable_mosaic.version = 11 : i64} {
  func.func @_gather_kernel(%arg0: memref<8x1xi32, #tpu.memory_space<vmem>>, %arg1: memref<2x1024xf32, #tpu.memory_space<vmem>>, %arg2: memref<8x128xf32, #tpu.memory_space<vmem>>) attributes {dimension_semantics = [], scalar_prefetch = 0 : i64, scratch_operands = 0 : i64, tpu.core_type = #tpu.core_type<tc>} {
    %c0 = arith.constant 0 : index
    %c0_0 = arith.constant 0 : index
    %0 = vector.load %arg0[%c0, %c0_0] : memref<8x1xi32, #tpu.memory_space<vmem>>, vector<8x1xi32>
    %1 = tpu.iota {dimensions = array<i32: 1>} : vector<8x1024xi32>
    %2 = vector.broadcast %0 : vector<8x1xi32> to vector<8x1024xi32>
    %3 = arith.cmpi eq, %1, %2 : vector<8x1024xi32>
    %c0_1 = arith.constant 0 : index
    %c0_2 = arith.constant 0 : index
    %4 = vector.load %arg1[%c0_1, %c0_2] : memref<2x1024xf32, #tpu.memory_space<vmem>>, vector<1x1024xf32>
    %c1 = arith.constant 1 : index
    %c0_3 = arith.constant 0 : index
    %5 = vector.load %arg1[%c1, %c0_3] : memref<2x1024xf32, #tpu.memory_space<vmem>>, vector<1x1024xf32>
    %cst = arith.constant 0.000000e+00 : f32
    %6 = vector.shape_cast %4 : vector<1x1024xf32> to vector<1x1024xf32>
    %7 = vector.broadcast %6 : vector<1x1024xf32> to vector<8x1024xf32>
    %8 = vector.broadcast %cst : f32 to vector<8x1024xf32>
    %9 = arith.select %3, %7, %8 : vector<8x1024xi1>, vector<8x1024xf32>
    %cst_4 = arith.constant dense<0.000000e+00> : vector<8xf32>
    %10 = vector.multi_reduction <add>, %9, %cst_4 [1] : vector<8x1024xf32> to vector<8xf32>
    %11 = vector.shape_cast %10 : vector<8xf32> to vector<8x1xf32>
    %cst_5 = arith.constant 0.000000e+00 : f32
    %12 = vector.shape_cast %5 : vector<1x1024xf32> to vector<1x1024xf32>
    %13 = vector.broadcast %12 : vector<1x1024xf32> to vector<8x1024xf32>
    %14 = vector.broadcast %cst_5 : f32 to vector<8x1024xf32>
    %15 = arith.select %3, %13, %14 : vector<8x1024xi1>, vector<8x1024xf32>
    %cst_6 = arith.constant dense<0.000000e+00> : vector<8xf32>
    %16 = vector.multi_reduction <add>, %15, %cst_6 [1] : vector<8x1024xf32> to vector<8xf32>
    %17 = vector.shape_cast %16 : vector<8xf32> to vector<8x1xf32>
    %18 = tpu.iota {dimensions = array<i32: 1>} : vector<8x128xi32>
    %c0_i32 = arith.constant 0 : i32
    %19 = vector.broadcast %c0_i32 : i32 to vector<8x128xi32>
    %20 = arith.cmpi eq, %18, %19 : vector<8x128xi32>
    %c1_i32 = arith.constant 1 : i32
    %21 = vector.broadcast %c1_i32 : i32 to vector<8x128xi32>
    %22 = arith.cmpi eq, %18, %21 : vector<8x128xi32>
    %cst_7 = arith.constant 0.000000e+00 : f32
    %23 = vector.shape_cast %17 : vector<8x1xf32> to vector<8x1xf32>
    %24 = vector.broadcast %23 : vector<8x1xf32> to vector<8x128xf32>
    %25 = vector.broadcast %cst_7 : f32 to vector<8x128xf32>
    %26 = arith.select %22, %24, %25 : vector<8x128xi1>, vector<8x128xf32>
    %27 = vector.shape_cast %11 : vector<8x1xf32> to vector<8x1xf32>
    %28 = vector.broadcast %27 : vector<8x1xf32> to vector<8x128xf32>
    %29 = arith.select %20, %28, %26 : vector<8x128xi1>, vector<8x128xf32>
    %c0_8 = arith.constant 0 : index
    %c0_9 = arith.constant 0 : index
    %30 = vector.load %arg2[%c0_8, %c0_9] : memref<8x128xf32, #tpu.memory_space<vmem>>, vector<8x128xf32>
    tpu.vector_store %arg2[%c0_8, %c0_9], %29 {strides = array<i32>} : memref<8x128xf32, #tpu.memory_space<vmem>>, vector<8x128xf32>,
    return
  }
}

</mosaic_0001>

<bundles_post_ra>
// kernel: _gather_call.1
= control target key start
LH: loop header
LB: loop body
LE: loop exit
PB: predicated region body
PF: predicated region fallthrough
CT: control target
= control target key end

     0   :  { %7 = vsyncpa [#allocation3], 0  ;;  %s319_s0 = inlined_call_operand.vmem [shape: s32[8,1], index: 0, kind: input, shape index: {}]   ;;  %s320_s1 = inlined_call_operand.hbm [shape: f32[2,1024], index: 1, kind: input, shape index: {}]   ;;  %s321_s2 = inlined_call_operand.hbm [shape: f32[8,128], index: 2, kind: output, shape index: {}]  }
   0x1   :  { %8 = vsyncpa [#allocation4], 0  ;;  %s236_s9 = smov [#allocation2]   ;;  %s188_s13 = scalar_lea.hbm %s320_s1, 256 }
   0x2   :  { %s17_s10 = sshll.u32 %s236_s9, 4  ;;  %p189_p0 = scmp.ne.s32.totalorder %s320_s1, %s188_s13  ;;  %s18_s10 = int_to_ptr.vmem [resolvable:$true] %s17_s10 }
   0x3   :  { %p192_p1 = scmp.lt.u32.totalorder %s188_s13, %s320_s1 }
   0x5   :  { %p194_p2 = pnand %p192_p1, %p189_p0 }
   0x7   :  { %197 = shalt.err (!%p194_p2)
}
   0x8   :  { %s198_s18 = scalar_lea.vmem %s18_s10, 256  ;;  %p203_p4 = scmp.lt.s32.totalorder %s18_s10, %s18_s10 }
   0x9   :  { %p199_p3 = scmp.ne.s32.totalorder %s18_s10, %s198_s18  ;;  %p204_p5 = scmp.lt.s32.totalorder %s198_s18, %s198_s18 }
   0xb   :  { %p205_p6 = por %p204_p5, %p203_p4 }
   0xd   :  { %p206_p7 = pnand %p205_p6, %p199_p3 }
   0xf   :  { %209 = shalt.err (!%p206_p7)
}
  0x10   :  { %20 = dma.hbm_to_vmem [thread:$0]  %s320_s1, 256, %s18_s10, [#allocation3]  }
  0x11   :  { %232 = dma.done.wait [#allocation3], 256  }
  0x12   :  { %233 = vsyncadd [#allocation3], 4294967040  ;;  %v237_v0 = vmov 0   ;;  %v24_v1 = vld [vmem:[%s319_s0] sm:$0xff]  ;;  %v25_v2 = vlaneseq  ;;  %s238_s0 = smov [#allocation5]  }
  0x13   :  { %187 = vset.pattern.permute.xlu0 %v237_v0  ;;  %v47_v7 = vld [vmem:[#allocation2 + $0x1] ss:$2 sm:$0xff]  ;;  %v45_v10 = vld [vmem:[#allocation2] ss:$2 sm:$0xff]  ;;  %s175_s1 = sshll.u32 %s238_s0, 4  ;;  %s176_s1 = int_to_ptr.vmem [resolvable:$true] %s175_s1 }
  0x14   :  { %35 = vperm.xlu0 %187, %v24_v1   ;;  %v269_v3 = vshrl.u32 %v25_v2, 7  ;;  %v271_v4 = vand.u32 127, %v25_v2  ;;  %s210_s23 = scalar_lea.vmem %s176_s1, 128  ;;  %p215_p9 = scmp.lt.s32.totalorder %s176_s1, %s176_s1 }
  0x15   :  { %p211_p8 = scmp.ne.s32.totalorder %s176_s1, %s210_s23  ;;  %p216_p10 = scmp.lt.s32.totalorder %s210_s23, %s210_s23 }
  0x16   :  { %v51_v5 = vsub.s32 0, %v269_v3  ;;  %v55_v6 = vsub.s32 1, %v269_v3  ;;  %v27_v8 = vadd.s32 128, %v271_v4  ;;  %v59_v9 = vsub.s32 2, %v269_v3 }
  0x17   :  { %v28_v11 = vadd.s32 256, %v271_v4  ;;  %v29_v15 = vadd.s32 384, %v271_v4  ;;  %v63_v16 = vsub.s32 3, %v269_v3  ;;  %v30_v19 = vadd.s32 512, %v271_v4  ;;  %p217_p11 = por %p216_p10, %p215_p9 }
  0x18   :  { %v110_v12 = vrot.slane %v47_v7, %v51_v5  ;;  %v114_v13 = vrot.slane %v47_v7, %v55_v6  ;;  %v52_v17 = vrot.slane %v45_v10, %v51_v5  ;;  %v56_v18 = vrot.slane %v45_v10, %v55_v6 }
  0x19   :  { %v67_v20 = vsub.s32 4, %v269_v3  ;;  %v118_v21 = vrot.slane %v47_v7, %v59_v9  ;;  %v31_v22 = vadd.s32 640, %v271_v4  ;;  %v32_v25 = vadd.s32 768, %v271_v4  ;;  %p218_p12 = pnand %p217_p11, %p211_p8 }
  0x1a   :  { %v71_v26 = vsub.s32 5, %v269_v3  ;;  %v122_v27 = vrot.slane %v47_v7, %v63_v16  ;;  %v60_v28 = vrot.slane %v45_v10, %v59_v9  ;;  %v75_v32 = vsub.s32 6, %v269_v3 }
  0x1b   :  { %v126_v33 = vrot.slane %v47_v7, %v67_v20  ;;  %v64_v35 = vrot.slane %v45_v10, %v63_v16  ;;  %v79_v36 = vsub.s32 7, %v269_v3  ;;  %v68_v41 = vrot.slane %v45_v10, %v67_v20 }
  0x1c   :  { %v130_v39 = vrot.slane %v47_v7, %v71_v26  ;;  %v33_v43 = vadd.s32 896, %v271_v4  ;;  %v134_v46 = vrot.slane %v47_v7, %v75_v32  ;;  %v72_v48 = vrot.slane %v45_v10, %v71_v26 }
  0x1d   :  { %v138_v52 = vrot.slane %v47_v7, %v79_v36  ;;  %v76_v54 = vrot.slane %v45_v10, %v75_v32  ;;  %v80_v59 = vrot.slane %v45_v10, %v79_v36  ;;  %vm165_vm8 = vcmp.eq.s32.totalorder %v271_v4, 1 }
  0x1e   :  { %vm164_vm9 = vcmp.eq.s32.totalorder %v271_v4, 0 }
  0x93   :  { %v36_v14 = vpop.permute.xlu0 %35 }
  0x94   :  { %vm37_vm0 = vcmp.eq.s32.totalorder %v271_v4, %v36_v14  ;;  %vm38_vm1 = vcmp.eq.s32.totalorder %v27_v8, %v36_v14  ;;  %vm39_vm2 = vcmp.eq.s32.totalorder %v28_v11, %v36_v14  ;;  %vm40_vm3 = vcmp.eq.s32.totalorder %v29_v15, %v36_v14 }
  0x95   :  { %v147_v23 = vsel %vm37_vm0, %v110_v12, 0.0  ;;  %v148_v24 = vsel %vm38_vm1, %v114_v13, 0.0  ;;  %v89_v30 = vsel %vm37_vm0, %v52_v17, 0.0  ;;  %v90_v31 = vsel %vm38_vm1, %v56_v18, 0.0 }
  0x96   :  { %v155_v29 = vadd.f32 %v148_v24, %v147_v23  ;;  %v149_v34 = vsel %vm39_vm2, %v118_v21, 0.0  ;;  %vm41_vm4 = vcmp.eq.s32.totalorder %v30_v19, %v36_v14  ;;  %v97_v38 = vadd.f32 %v90_v31, %v89_v30 }
  0x97   :  { %v150_v40 = vsel %vm40_vm3, %v122_v27, 0.0  ;;  %v91_v42 = vsel %vm39_vm2, %v60_v28, 0.0  ;;  %vm42_vm5 = vcmp.eq.s32.totalorder %v31_v22, %v36_v14  ;;  %v151_v47 = vsel %vm41_vm4, %v126_v33, 0.0 }
  0x98   :  { %v156_v37 = vadd.f32 %v155_v29, %v149_v34  ;;  %v98_v45 = vadd.f32 %v97_v38, %v91_v42  ;;  %v92_v49 = vsel %vm40_vm3, %v64_v35, 0.0  ;;  %vm43_vm6 = vcmp.eq.s32.totalorder %v32_v25, %v36_v14 }
  0x99   :  { %v152_v53 = vsel %vm42_vm5, %v130_v39, 0.0  ;;  %v93_v55 = vsel %vm41_vm4, %v68_v41, 0.0  ;;  %vm44_vm7 = vcmp.eq.s32.totalorder %v33_v43, %v36_v14  ;;  %v153_v58 = vsel %vm43_vm6, %v134_v46, 0.0 }
  0x9a   :  { %v157_v44 = vadd.f32 %v156_v37, %v150_v40  ;;  %v99_v51 = vadd.f32 %v98_v45, %v92_v49  ;;  %v94_v60 = vsel %vm42_vm5, %v72_v48, 0.0  ;;  %v154_v63 = vsel %vm44_vm7, %v138_v52, 0.0 }
  0x9b   :  { %v95_v0 = vsel %vm43_vm6, %v76_v54, 0.0  ;;  %v96_v3 = vsel %vm44_vm7, %v80_v59, 0.0 }
  0x9c   :  { %v158_v50 = vadd.f32 %v157_v44, %v151_v47  ;;  %v100_v57 = vadd.f32 %v99_v51, %v93_v55 }
  0x9e   :  { %v159_v56 = vadd.f32 %v158_v50, %v152_v53  ;;  %v101_v62 = vadd.f32 %v100_v57, %v94_v60 }
  0xa0   :  { %v160_v61 = vadd.f32 %v159_v56, %v153_v58  ;;  %v102_v2 = vadd.f32 %v101_v62, %v95_v0 }
  0xa2   :  { %v161_v1 = vadd.f32 %v160_v61, %v154_v63  ;;  %v103_v5 = vadd.f32 %v102_v2, %v96_v3 }
  0xa4   :  { %162 = vadd.xlane.f32.xlu0 %v161_v1  ;;  %104 = vadd.xlane.f32.xlu1 %v103_v5 }
 0x131   :  { %v163_v6 = vpop.xlane.xlu0 %162  ;;  %v105_v8 = vpop.xlane.xlu1 %104 }
 0x132   :  { %v166_v7 = vsel %vm165_vm8, %v163_v6, 0.0 }
 0x133   :  { %v167_v9 = vsel %vm164_vm9, %v105_v8, %v166_v7 }
 0x134   :  { %168 = vst [vmem:[#allocation5] sm:$0xff] %v167_v9 }
 0x135   :  { %221 = shalt.err (!%p218_p12)
}
 0x136   :  { %s222_s26 = scalar_lea.hbm %s321_s2, 128 }
 0x137   :  { %p223_p13 = scmp.ne.s32.totalorder %s321_s2, %s222_s26  ;;  %p226_p0 = scmp.lt.u32.totalorder %s222_s26, %s321_s2 }
 0x139   :  { %p228_p1 = pnand %p226_p0, %p223_p13 }
 0x13b   :  { %231 = shalt.err (!%p228_p1)
}
 0x13c   :  { %178 = dma.vmem_to_hbm [thread:$0]  %s176_s1, 128, %s321_s2, [#allocation4]  }
 0x13d   :  { %234 = dma.done.wait [#allocation4], 128  }
 0x13e   :  { %235 = vsyncadd [#allocation4], 4294967168 }
 0x13f   :  { %182 = vsyncpa [#allocation3], 1 }
 0x140   :  { %183 = vsyncpa [#allocation4], 1 }

</bundles_post_ra>
